<compile_context>
chip_gen: v7x
topology: tpu7x:2x2x1
jax: 0.10.0
libtpu: 0.0.40
codegen_flags: <defaults>
</compile_context>

<pallas_src>
import functools

import jax
import jax.numpy as jnp
from jax.experimental import pallas as pl
from jax.experimental.pallas import tpu as pltpu


# ----------------------------- Pallas kernel ------------------------------- #
def _dgc_kernel(inp_ref, st_ref, sup_ref, w_ref, b_ref, out_ref, *, S, K):
    """One batch tile per grid step.

    inp_ref : (Bt, N, Din)  f32
    st_ref  : (Bt, N, Dh)   f32
    sup_ref : (S, N, N)     compute dtype (bf16 or f32), resident
    w_ref   : (M*F, O)      compute dtype, rows permuted to (m*F + f), resident
    b_ref   : (1, O)        f32
    out_ref : (Bt*N, O)     f32, rows ordered (b major, n minor)
    """
    bt, N, d_in = inp_ref.shape
    d_h = st_ref.shape[2]
    F = d_in + d_h
    cdt = sup_ref.dtype                     # MXU feed dtype (bf16 by default)

    # ---- x0 in diffusion layout (N, Bt*F): lanes ordered (b major, f minor).
    #      Feature concat of inputs+state happens here, in VMEM/vregs.
    cols = [jnp.concatenate([inp_ref[b], st_ref[b]], axis=-1) for b in range(bt)]
    x0 = jnp.concatenate(cols, axis=-1) if bt > 1 else cols[0]      # (N, Bt*F) f32

    # ---- Chebyshev diffusion recursion; intermediates kept in f32, MXU fed cdt.
    slabs = [x0]                                          # m = 0 : identity term
    if K > 0:
        for _s in range(S):
            sup = sup_ref[_s]                                        # (N, N)
            x1 = jnp.dot(sup, x0.astype(cdt),
                         preferred_element_type=jnp.float32)         # (N, Bt*F)
            slabs.append(x1)
            for _k in range(2, K + 1):
                x2 = 2.0 * jnp.dot(sup, x1.astype(cdt),
                                   preferred_element_type=jnp.float32) - x0
                slabs.append(x2)
                x1, x0 = x2, x1     # exact clobbering semantics of the torch code

    # ---- Pack X_cat (Bt*N, M*F): rows (b major, n minor), cols (m major, f minor).
    #      Static lane slices + concats only (no dynamic transposes).
    per_b = [jnp.concatenate([slab[:, b * F:(b + 1) * F] for slab in slabs],
                             axis=-1)                                # (N, M*F)
             for b in range(bt)]
    x_cat = (jnp.concatenate(per_b, axis=0) if bt > 1 else per_b[0]).astype(cdt)

    # ---- One fused projection matmul (contraction depth M*F), f32 accumulation.
    y = jnp.dot(x_cat, w_ref[...], preferred_element_type=jnp.float32)  # (Bt*N, O)
    out_ref[...] = y + b_ref[...]


# ------------------------------- wrapper ------------------------------------ #
def diffusion_graph_conv(inputs, state, supports, weight, biases, *,
                         node_num, max_diffusion_step, output_dim,
                         batch_tile=None, compute_dtype=jnp.bfloat16):
    """inputs: (B, N*input_dim), state: (B, N*hid_dim), supports: (S, N, N)
    weight: (F*M, O) (torch row order f*M + m), biases: (O,).
    Returns (B, N*output_dim), matching the torch module."""
    B = inputs.shape[0]
    N = node_num
    K = max_diffusion_step
    S = supports.shape[0]
    d_in = inputs.shape[1] // N
    d_h = state.shape[1] // N
    F_ = d_in + d_h
    M = S * K + 1
    O = output_dim

    bt = B if batch_tile is None else batch_tile
    assert B % bt == 0, "batch_tile must divide batch"

    # Free row-major reshapes; NO HBM concat of inputs+state (done in-kernel).
    inp3 = inputs.reshape(B, N, d_in).astype(jnp.float32)
    st3 = state.reshape(B, N, d_h).astype(jnp.float32)

    # Small resident operands go in the MXU feed dtype.
    sup_c = supports.astype(compute_dtype)
    # torch weight rows are indexed by (f*M + m); permute once to (m*F + f).
    w_perm = (weight.reshape(F_, M, O).transpose(1, 0, 2)
              .reshape(M * F_, O).astype(compute_dtype))
    bias2d = biases.reshape(1, O).astype(jnp.float32)

    kernel = functools.partial(_dgc_kernel, S=S, K=K)

    out = pl.pallas_call(
        kernel,
        out_shape=jax.ShapeDtypeStruct((B * N, O), jnp.float32),
        grid_spec=pltpu.PrefetchScalarGridSpec(
            num_scalar_prefetch=0,
            grid=(B // bt,),
            in_specs=[
                pl.BlockSpec((bt, N, d_in), lambda i: (i, 0, 0)),   # inputs tile
                pl.BlockSpec((bt, N, d_h), lambda i: (i, 0, 0)),    # state tile
                pl.BlockSpec((S, N, N), lambda i: (0, 0, 0)),       # resident supports
                pl.BlockSpec((M * F_, O), lambda i: (0, 0)),        # resident weight
                pl.BlockSpec((1, O), lambda i: (0, 0)),             # bias
            ],
            out_specs=pl.BlockSpec((bt * N, O), lambda i: (i, 0)),
        ),
        compiler_params=pltpu.CompilerParams(
            dimension_semantics=("parallel",)),
    )(inp3, st3, sup_c, w_perm, bias2d)

    # (B*N, O) -> (B, N*O): pure row-major reshape, free in XLA.
    return out.reshape(B, N * O)


# --------------------------- pure-JAX reference ----------------------------- #
def _reference(inputs, state, supports, weight, biases, *,
               node_num, max_diffusion_step, output_dim):
    """Direct transcription of the PyTorch forward (for verification)."""
    B = inputs.shape[0]
    N = node_num
    K = max_diffusion_step
    inp = inputs.reshape(B, N, -1)
    st = state.reshape(B, N, -1)
    xin = jnp.concatenate([inp, st], axis=2)              # (B, N, F)
    F_ = xin.shape[2]
    x0 = jnp.transpose(xin, (1, 2, 0)).reshape(N, F_ * B)
    xs = [x0]
    for s in range(supports.shape[0]):
        if K == 0:
            break
        sup = supports[s]
        x1 = sup @ x0
        xs.append(x1)
        for _k in range(2, K + 1):
            x2 = 2.0 * (sup @ x1) - x0
            xs.append(x2)
            x1, x0 = x2, x1
    M = len(xs)
    xcat = jnp.stack(xs, axis=0)                          # (M, N, F*B)
    xcat = xcat.reshape(M, N, F_, B)
    xcat = jnp.transpose(xcat, (3, 1, 2, 0))              # (B, N, F, M)
    xcat = xcat.reshape(B * N, F_ * M)
    y = xcat @ weight + biases
    return y.reshape(B, N * output_dim)


# ---------------------------------- main ------------------------------------ #
if __name__ == "__main__":
    # Module hyper-parameters (small, consistent with the forward pass)
    node_num = 16
    input_dim = 8
    hid_dim = 24
    output_dim = 32
    supports_len = 2
    max_diffusion_step = 2
    batch = 2

    F_ = input_dim + hid_dim
    M = supports_len * max_diffusion_step + 1

    key = jax.random.PRNGKey(0)
    k_w, k_in, k_st, k_sup = jax.random.split(key, 4)

    # Deterministic parameter init (xavier_normal_ with gain=1.414, zero bias)
    fan_in, fan_out = F_ * M, output_dim
    std = 1.414 * (2.0 / (fan_in + fan_out)) ** 0.5
    weight = std * jax.random.normal(k_w, (F_ * M, output_dim), dtype=jnp.float32)
    biases = jnp.zeros((output_dim,), dtype=jnp.float32)

    # Example inputs (flat, as the torch forward expects)
    inputs = jax.random.normal(k_in, (batch, node_num * input_dim), dtype=jnp.float32)
    state = jax.random.normal(k_st, (batch, node_num * hid_dim), dtype=jnp.float32)

    # Dense supports (row-normalized random adjacency); torch.sparse.mm == dense matmul here.
    raw = jax.random.uniform(k_sup, (supports_len, node_num, node_num), dtype=jnp.float32)
    supports = raw / jnp.sum(raw, axis=-1, keepdims=True)

    ref = _reference(
        inputs, state, supports, weight, biases,
        node_num=node_num, max_diffusion_step=max_diffusion_step,
        output_dim=output_dim)

    # f32 MXU path: tight comparison against the f32 reference.
    out_f32 = diffusion_graph_conv(
        inputs, state, supports, weight, biases,
        node_num=node_num, max_diffusion_step=max_diffusion_step,
        output_dim=output_dim, compute_dtype=jnp.float32)
    out_f32 = jax.block_until_ready(out_f32)
    assert out_f32.shape == (batch, node_num * output_dim)
    assert jnp.allclose(out_f32, ref, rtol=1e-4, atol=1e-4), "f32 kernel mismatch"

    # Default bf16-fed MXU path (f32 accumulation): looser tolerance vs f32 ref.
    out_bf16 = diffusion_graph_conv(
        inputs, state, supports, weight, biases,
        node_num=node_num, max_diffusion_step=max_diffusion_step,
        output_dim=output_dim)
    out_bf16 = jax.block_until_ready(out_bf16)
    assert out_bf16.shape == (batch, node_num * output_dim)
    assert jnp.allclose(out_bf16, ref, rtol=5e-2, atol=5e-2), "bf16 kernel mismatch"

    print("KERNEL_OK")
</pallas_src>

<mosaic_0001>
module attributes {stable_mosaic.version = 11 : i64} {
  func.func @_dgc_kernel(%arg0: i32, %arg1: memref<2x16x8xf32, #tpu.memory_space<vmem>>, %arg2: memref<2x16x24xf32, #tpu.memory_space<vmem>>, %arg3: memref<2x16x16xf32, #tpu.memory_space<vmem>>, %arg4: memref<160x32xf32, #tpu.memory_space<vmem>>, %arg5: memref<1x32xf32, #tpu.memory_space<vmem>>, %arg6: memref<32x32xf32, #tpu.memory_space<vmem>>) attributes {dimension_semantics = [#tpu.dimension_semantics<parallel>], iteration_bounds = array<i64: 1>, scalar_prefetch = 0 : i64, scratch_operands = 0 : i64, tpu.core_type = #tpu.core_type<tc>, window_params = [{transform_indices = @transform_0, window_bounds = array<i64: 2, 16, 8>}, {transform_indices = @transform_1, window_bounds = array<i64: 2, 16, 24>}, {pipeline_mode = #tpu.pipeline_mode<synchronous>, transform_indices = @transform_2, window_bounds = array<i64: 2, 16, 16>}, {pipeline_mode = #tpu.pipeline_mode<synchronous>, transform_indices = @transform_3, window_bounds = array<i64: 160, 32>}, {pipeline_mode = #tpu.pipeline_mode<synchronous>, transform_indices = @transform_4, window_bounds = array<i64: 1, 32>}, {transform_indices = @transform_5, window_bounds = array<i64: 32, 32>}]} {
    %c0 = arith.constant 0 : index
    %c0_0 = arith.constant 0 : index
    %c0_1 = arith.constant 0 : index
    %0 = vector.load %arg1[%c0, %c0_0, %c0_1] : memref<2x16x8xf32, #tpu.memory_space<vmem>>, vector<1x16x8xf32>
    %1 = vector.shape_cast %0 : vector<1x16x8xf32> to vector<16x8xf32>
    %c0_2 = arith.constant 0 : index
    %c0_3 = arith.constant 0 : index
    %c0_4 = arith.constant 0 : index
    %2 = vector.load %arg2[%c0_2, %c0_3, %c0_4] : memref<2x16x24xf32, #tpu.memory_space<vmem>>, vector<1x16x24xf32>
    %3 = vector.shape_cast %2 : vector<1x16x24xf32> to vector<16x24xf32>
    %4 = tpu.concatenate %1, %3 in 1 : vector<16x8xf32>, vector<16x24xf32> -> vector<16x32xf32>
    %c1 = arith.constant 1 : index
    %c0_5 = arith.constant 0 : index
    %c0_6 = arith.constant 0 : index
    %5 = vector.load %arg1[%c1, %c0_5, %c0_6] : memref<2x16x8xf32, #tpu.memory_space<vmem>>, vector<1x16x8xf32>
    %6 = vector.shape_cast %5 : vector<1x16x8xf32> to vector<16x8xf32>
    %c1_7 = arith.constant 1 : index
    %c0_8 = arith.constant 0 : index
    %c0_9 = arith.constant 0 : index
    %7 = vector.load %arg2[%c1_7, %c0_8, %c0_9] : memref<2x16x24xf32, #tpu.memory_space<vmem>>, vector<1x16x24xf32>
    %8 = vector.shape_cast %7 : vector<1x16x24xf32> to vector<16x24xf32>
    %9 = tpu.concatenate %6, %8 in 1 : vector<16x8xf32>, vector<16x24xf32> -> vector<16x32xf32>
    %10 = tpu.concatenate %4, %9 in 1 : vector<16x32xf32>, vector<16x32xf32> -> vector<16x64xf32>
    %c0_10 = arith.constant 0 : index
    %c0_11 = arith.constant 0 : index
    %c0_12 = arith.constant 0 : index
    %11 = vector.load %arg3[%c0_10, %c0_11, %c0_12] : memref<2x16x16xf32, #tpu.memory_space<vmem>>, vector<1x16x16xf32>
    %12 = vector.shape_cast %11 : vector<1x16x16xf32> to vector<16x16xf32>
    %cst = arith.constant dense<0.000000e+00> : vector<16x64xf32>
    %13 = tpu.matmul %12, %10, %cst {dimension_numbers = #tpu.dot_dimension_numbers<[1], [0], [0], [1], [0, 0, 1, 1], [], []>} : vector<16x16xf32>, vector<16x64xf32>, vector<16x64xf32> -> vector<16x64xf32>
    %cst_13 = arith.constant dense<0.000000e+00> : vector<16x64xf32>
    %14 = tpu.matmul %12, %13, %cst_13 {dimension_numbers = #tpu.dot_dimension_numbers<[1], [0], [0], [1], [0, 0, 1, 1], [], []>} : vector<16x16xf32>, vector<16x64xf32>, vector<16x64xf32> -> vector<16x64xf32>
    %cst_14 = arith.constant 2.000000e+00 : f32
    %15 = vector.broadcast %cst_14 : f32 to vector<16x64xf32>
    %16 = arith.mulf %15, %14 : vector<16x64xf32>
    %17 = arith.subf %16, %10 : vector<16x64xf32>
    %c1_15 = arith.constant 1 : index
    %c0_16 = arith.constant 0 : index
    %c0_17 = arith.constant 0 : index
    %18 = vector.load %arg3[%c1_15, %c0_16, %c0_17] : memref<2x16x16xf32, #tpu.memory_space<vmem>>, vector<1x16x16xf32>
    %19 = vector.shape_cast %18 : vector<1x16x16xf32> to vector<16x16xf32>
    %cst_18 = arith.constant dense<0.000000e+00> : vector<16x64xf32>
    %20 = tpu.matmul %19, %13, %cst_18 {dimension_numbers = #tpu.dot_dimension_numbers<[1], [0], [0], [1], [0, 0, 1, 1], [], []>} : vector<16x16xf32>, vector<16x64xf32>, vector<16x64xf32> -> vector<16x64xf32>
    %cst_19 = arith.constant dense<0.000000e+00> : vector<16x64xf32>
    %21 = tpu.matmul %19, %20, %cst_19 {dimension_numbers = #tpu.dot_dimension_numbers<[1], [0], [0], [1], [0, 0, 1, 1], [], []>} : vector<16x16xf32>, vector<16x64xf32>, vector<16x64xf32> -> vector<16x64xf32>
    %cst_20 = arith.constant 2.000000e+00 : f32
    %22 = vector.broadcast %cst_20 : f32 to vector<16x64xf32>
    %23 = arith.mulf %22, %21 : vector<16x64xf32>
    %24 = arith.subf %23, %13 : vector<16x64xf32>
    %25 = vector.extract_strided_slice %10 {offsets = [0, 0], sizes = [16, 32], strides = [1, 1]} : vector<16x64xf32> to vector<16x32xf32>
    %26 = vector.extract_strided_slice %13 {offsets = [0, 0], sizes = [16, 32], strides = [1, 1]} : vector<16x64xf32> to vector<16x32xf32>
    %27 = vector.extract_strided_slice %17 {offsets = [0, 0], sizes = [16, 32], strides = [1, 1]} : vector<16x64xf32> to vector<16x32xf32>
    %28 = vector.extract_strided_slice %20 {offsets = [0, 0], sizes = [16, 32], strides = [1, 1]} : vector<16x64xf32> to vector<16x32xf32>
    %29 = vector.extract_strided_slice %24 {offsets = [0, 0], sizes = [16, 32], strides = [1, 1]} : vector<16x64xf32> to vector<16x32xf32>
    %30 = tpu.concatenate %25, %26, %27, %28, %29 in 1 : vector<16x32xf32>, vector<16x32xf32>, vector<16x32xf32>, vector<16x32xf32>, vector<16x32xf32> -> vector<16x160xf32>
    %31 = vector.extract_strided_slice %10 {offsets = [0, 32], sizes = [16, 32], strides = [1, 1]} : vector<16x64xf32> to vector<16x32xf32>
    %32 = vector.extract_strided_slice %13 {offsets = [0, 32], sizes = [16, 32], strides = [1, 1]} : vector<16x64xf32> to vector<16x32xf32>
    %33 = vector.extract_strided_slice %17 {offsets = [0, 32], sizes = [16, 32], strides = [1, 1]} : vector<16x64xf32> to vector<16x32xf32>
    %34 = vector.extract_strided_slice %20 {offsets = [0, 32], sizes = [16, 32], strides = [1, 1]} : vector<16x64xf32> to vector<16x32xf32>
    %35 = vector.extract_strided_slice %24 {offsets = [0, 32], sizes = [16, 32], strides = [1, 1]} : vector<16x64xf32> to vector<16x32xf32>
    %36 = tpu.concatenate %31, %32, %33, %34, %35 in 1 : vector<16x32xf32>, vector<16x32xf32>, vector<16x32xf32>, vector<16x32xf32>, vector<16x32xf32> -> vector<16x160xf32>
    %37 = tpu.concatenate %30, %36 in 0 : vector<16x160xf32>, vector<16x160xf32> -> vector<32x160xf32>
    %c0_21 = arith.constant 0 : index
    %c0_22 = arith.constant 0 : index
    %38 = vector.load %arg4[%c0_21, %c0_22] : memref<160x32xf32, #tpu.memory_space<vmem>>, vector<160x32xf32>
    %cst_23 = arith.constant dense<0.000000e+00> : vector<32x32xf32>
    %39 = tpu.matmul %37, %38, %cst_23 {dimension_numbers = #tpu.dot_dimension_numbers<[1], [0], [0], [1], [0, 0, 1, 1], [], []>} : vector<32x160xf32>, vector<160x32xf32>, vector<32x32xf32> -> vector<32x32xf32>
    %c0_24 = arith.constant 0 : index
    %c0_25 = arith.constant 0 : index
    %40 = vector.load %arg5[%c0_24, %c0_25] : memref<1x32xf32, #tpu.memory_space<vmem>>, vector<1x32xf32>
    %41 = vector.broadcast %40 : vector<1x32xf32> to vector<32x32xf32>
    %42 = arith.addf %39, %41 : vector<32x32xf32>
    %c0_26 = arith.constant 0 : index
    %c0_27 = arith.constant 0 : index
    %43 = vector.load %arg6[%c0_26, %c0_27] : memref<32x32xf32, #tpu.memory_space<vmem>>, vector<32x32xf32>
    tpu.vector_store %arg6[%c0_26, %c0_27], %42 {strides = array<i32>} : memref<32x32xf32, #tpu.memory_space<vmem>>, vector<32x32xf32>,
    return
  }
  func.func @transform_0(%arg0: i32) -> (i32, i32, i32) {
    %c0_i32 = arith.constant 0 : i32
    %c0_i32_0 = arith.constant 0 : i32
    %c0_i32_1 = arith.constant 0 : i32
    return %arg0, %c0_i32, %c0_i32_0 : i32, i32, i32
  }
  func.func @transform_1(%arg0: i32) -> (i32, i32, i32) {
    %c0_i32 = arith.constant 0 : i32
    %c0_i32_0 = arith.constant 0 : i32
    %c0_i32_1 = arith.constant 0 : i32
    return %arg0, %c0_i32, %c0_i32_0 : i32, i32, i32
  }
  func.func @transform_2(%arg0: i32) -> (i32, i32, i32) {
    %c0_i32 = arith.constant 0 : i32
    %c0_i32_0 = arith.constant 0 : i32
    %c0_i32_1 = arith.constant 0 : i32
    %c0_i32_2 = arith.constant 0 : i32
    return %c0_i32, %c0_i32_0, %c0_i32_1 : i32, i32, i32
  }
  func.func @transform_3(%arg0: i32) -> (i32, i32) {
    %c0_i32 = arith.constant 0 : i32
    %c0_i32_0 = arith.constant 0 : i32
    %c0_i32_1 = arith.constant 0 : i32
    return %c0_i32, %c0_i32_0 : i32, i32
  }
  func.func @transform_4(%arg0: i32) -> (i32, i32) {
    %c0_i32 = arith.constant 0 : i32
    %c0_i32_0 = arith.constant 0 : i32
    %c0_i32_1 = arith.constant 0 : i32
    return %c0_i32, %c0_i32_0 : i32, i32
  }
  func.func @transform_5(%arg0: i32) -> (i32, i32) {
    %c0_i32 = arith.constant 0 : i32
    %c0_i32_0 = arith.constant 0 : i32
    return %arg0, %c0_i32 : i32, i32
  }
}

</mosaic_0001>

<bundles_post_ra>
// kernel: tpu_custom_call.1
= control target key start
LH: loop header
LB: loop body
LE: loop exit
PB: predicated region body
PF: predicated region fallthrough
CT: control target
= control target key end

     0   :  { %s783_s22 = smov 8   ;;  %s1022_s0 = inlined_call_operand.vmem [shape: f32[2,16,8], index: 0, kind: input, shape index: {}]   ;;  %s1023_s1 = inlined_call_operand.vmem [shape: f32[2,16,24], index: 1, kind: input, shape index: {}]   ;;  %s1024_s2 = inlined_call_operand.vmem [shape: f32[2,16,16], index: 2, kind: input, shape index: {}]   ;;  %s1025_s3 = inlined_call_operand.vmem [shape: f32[160,32], index: 3, kind: input, shape index: {}]   ;;  %s1026_s4 = inlined_call_operand.vmem [shape: f32[1,32], index: 4, kind: input, shape index: {}]   ;;  %s1027_s5 = inlined_call_operand.hbm [shape: f32[32,32], index: 5, kind: output, shape index: {}]  }
   0x1   :  { %v595_v0 = vld [vmem:[%s1023_s1 + $0x10] sm:$0xff]  ;;  %v23_v1 = vld [vmem:[%s1023_s1] sm:$0xff]  ;;  %v596_v2 = vld [vmem:[%s1023_s1 + $0x18] sm:$0xff] }
   0x2   :  { %44 = vrot.lane.b32.xlu0 %v595_v0, %s783_s22  ;;  %27 = vrot.lane.b32.xlu1 %v23_v1, %s783_s22  ;;  %v24_v3 = vld [vmem:[%s1023_s1 + $0x8] sm:$0xff] }
   0x3   :  { %10 = vsyncpa [#allocation3], 0  ;;  %v63_v4 = vld [vmem:[%s1024_s2] sm:$0xff]  ;;  %vm65_vm0 = vcmask 130048   ;;  %vm33_vm1 = vcmask 64512   ;;  %v593_v5 = vld [vmem:[%s1022_s0 + $0x10] sm:$0xff] }
   0x4   :  { %632 = vmatprep.mubr.msk.f32.mxu0 %vm65_vm0, %v63_v4  ;;  %639 = vmatprep.mubr.msk.f32.mxu1 %vm65_vm0, %v63_v4  ;;  %s784_s1 = smov 32   ;;  %v594_v8 = vld [vmem:[%s1022_s0 + $0x18] sm:$0xff]  ;;  %v21_v13 = vld [vmem:[%s1022_s0] sm:$0xff]  ;;  %v22_v14 = vld [vmem:[%s1022_s0 + $0x8] sm:$0xff]  ;;  %vm60_vm2 = vcmask 261120   ;;  %s785_s17 = smov 96  }
   0x5   :  { %v64_v22 = vld [vmem:[%s1024_s2 + $0x8] sm:$0xff]  ;;  %v601_v23 = vld [vmem:[%s1024_s2 + $0x10] sm:$0xff]  ;;  %v602_v27 = vld [vmem:[%s1024_s2 + $0x18] sm:$0xff]  ;;  %v786_v48 = vmov 0.0|0.0   ;;  %s787_s9 = smov 64   ;;  %vm415_vm3 = vcmask 523264  }
   0x6   :  { %46 = vrot.lane.b32.xlu0 %v596_v2, %s783_s22  ;;  %29 = vrot.lane.b32.xlu1 %v24_v3, %s783_s22  ;;  %v453_v43 = vld [vmem:[%s1025_s3] sm:$0xff]  ;;  %v454_v44 = vld [vmem:[%s1025_s3 + $0x8] sm:$0xff]  ;;  %vm418_vm4 = vcmask 785408  }
   0x7   :  { %v455_v45 = vld [vmem:[%s1025_s3 + $0x10] sm:$0xff]  ;;  %v673_v46 = vpack.c.bf16 %v454_v44, %v453_v43  ;;  %v456_v47 = vld [vmem:[%s1025_s3 + $0x18] sm:$0xff]  ;;  %v457_v50 = vld [vmem:[%s1025_s3 + $0x20] sm:$0xff] }
   0x8   :  { %v676_v49 = vpack.c.bf16 %v456_v47, %v455_v45  ;;  %v458_v51 = vld [vmem:[%s1025_s3 + $0x28] sm:$0xff]  ;;  %v459_v53 = vld [vmem:[%s1025_s3 + $0x30] sm:$0xff]  ;;  %v460_v54 = vld [vmem:[%s1025_s3 + $0x38] sm:$0xff] }
   0x9   :  { %v679_v52 = vpack.c.bf16 %v458_v51, %v457_v50  ;;  %v682_v55 = vpack.c.bf16 %v460_v54, %v459_v53  ;;  %v461_v56 = vld [vmem:[%s1025_s3 + $0x40] sm:$0xff]  ;;  %v462_v57 = vld [vmem:[%s1025_s3 + $0x48] sm:$0xff]  ;;  %v463_v59 = vld [vmem:[%s1025_s3 + $0x50] sm:$0xff] }
   0xa   :  { %v685_v58 = vpack.c.bf16 %v462_v57, %v461_v56  ;;  %v464_v60 = vld [vmem:[%s1025_s3 + $0x58] sm:$0xff]  ;;  %v465_v62 = vld [vmem:[%s1025_s3 + $0x60] sm:$0xff]  ;;  %v466_v63 = vld [vmem:[%s1025_s3 + $0x68] sm:$0xff] }
   0xb   :  { %v688_v61 = vpack.c.bf16 %v464_v60, %v463_v59  ;;  %v691_v0 = vpack.c.bf16 %v466_v63, %v465_v62  ;;  %v467_v1 = vld [vmem:[%s1025_s3 + $0x70] sm:$0xff]  ;;  %v468_v2 = vld [vmem:[%s1025_s3 + $0x78] sm:$0xff]  ;;  %v469_v4 = vld [vmem:[%s1025_s3 + $0x80] sm:$0xff] }
   0xc   :  { %v694_v3 = vpack.c.bf16 %v468_v2, %v467_v1 }
  0x74   :  { %v45_v6 = vpop.permute.xlu0 %44  ;;  %v28_v11 = vpop.permute.xlu1 %27 }
  0x75   :  { %v50_v7 = vsel %vm33_vm1, %v593_v5, %v45_v6  ;;  %v34_v16 = vsel %vm33_vm1, %v21_v13, %v28_v11  ;;  %v470_v5 = vld [vmem:[%s1025_s3 + $0x88] sm:$0xff] }
  0x76   :  { %54 = vrot.lane.b32.xlu0 %v50_v7, %s784_s1  ;;  %v697_v6 = vpack.c.bf16 %v470_v5, %v469_v4  ;;  %v471_v7 = vld [vmem:[%s1025_s3 + $0x90] sm:$0xff] }
  0x78   :  { %v47_v9 = vpop.permute.xlu0 %46  ;;  %v30_v12 = vpop.permute.xlu1 %29 }
  0x79   :  { %v51_v10 = vsel %vm33_vm1, %v594_v8, %v47_v9  ;;  %v35_v17 = vsel %vm33_vm1, %v22_v14, %v30_v12  ;;  %v472_v8 = vld [vmem:[%s1025_s3 + $0x98] sm:$0xff] }
  0x7a   :  { %56 = vrot.lane.b32.xlu1 %v51_v10, %s784_s1  ;;  %v700_v9 = vpack.c.bf16 %v472_v8, %v471_v7 }
  0xe8   :  { %v55_v15 = vpop.permute.xlu0 %54 }
  0xe9   :  { %v860_v19 = vsel %vm60_vm2, %v34_v16, %v55_v15 }
  0xec   :  { %v57_v18 = vpop.permute.xlu1 %56 }
  0xed   :  { %v863_v20 = vsel %vm60_vm2, %v35_v17, %v57_v18 }
  0xee   :  { %v656_v21 = vpack.c.bf16 %v863_v20, %v860_v19 }
  0xf0   :  { %657 = vmatprep.subr.bf16.mxu0 %v656_v21 }
  0xf1   :  { %659 = vmatpush3.bf16.msra.mxu0 %v656_v21 }
  0xf4   :  { %633 = vmatmul.mubr.msk.f32.vlgmr.msra.gmra.mrb[0].mxu0 %vm65_vm0, %v64_v22 }
  0xf5   :  { %646 = vmatprep.mubr.msk.f32.mxu0 %vm65_vm0, %v601_v23 }
 0x1c7   :  { %v875_v24 = vpop.f32.mrb[0].mxu0 }
 0x1c8   :  { %v877_v25 = vpop.f32.mrb[1].mxu0 }
 0x1c9   :  { %v660_v26 = vpack.c.bf16 %v875_v24, %v877_v25 }
 0x1cb   :  { %661 = vmatprep.subr.bf16.mxu1 %v660_v26  ;;  %665 = vmatprep.subr.bf16.mxu0 %v660_v26 }
 0x1cc   :  { %663 = vmatpush3.bf16.msra.mxu1 %v660_v26  ;;  %667 = vmatpush3.bf16.msra.mxu0 %v660_v26 }
 0x1cd   :  { %672 = vmatprep.subr.bf16.mxu0 %v786_v48 }
 0x1cf   :  { %640 = vmatmul.mubr.msk.f32.vlgmr.msra.gmra.mrb[0].mxu1 %vm65_vm0, %v64_v22  ;;  %647 = vmatmul.mubr.msk.f32.vlgmr.msra.gmra.mrb[2].mxu0 %vm65_vm0, %v602_v27 }
 0x1d0   :  { %653 = vmatprep.mubr.msk.f32.mxu1 %vm65_vm0, %v601_v23  ;;  %674 = vmatpush1.bf16.msra.mxu0 %v673_v46 }
 0x1d1   :  { %675 = vmatprep.subr.bf16.mxu0 %v786_v48 }
 0x1d4   :  { %677 = vmatpush1.bf16.msra.mxu0 %v676_v49 }
 0x1d5   :  { %678 = vmatprep.subr.bf16.mxu0 %v786_v48 }
 0x1d8   :  { %680 = vmatpush1.bf16.msra.mxu0 %v679_v52 }
 0x1d9   :  { %681 = vmatprep.subr.bf16.mxu0 %v786_v48 }
 0x1dc   :  { %683 = vmatpush1.bf16.msra.mxu0 %v682_v55 }
 0x1dd   :  { %684 = vmatprep.subr.bf16.mxu0 %v786_v48 }
 0x1e0   :  { %686 = vmatpush1.bf16.msra.mxu0 %v685_v58 }
 0x1e1   :  { %687 = vmatprep.subr.bf16.mxu0 %v786_v48 }
 0x1e4   :  { %689 = vmatpush1.bf16.msra.mxu0 %v688_v61 }
 0x1e5   :  { %690 = vmatprep.subr.bf16.mxu0 %v786_v48 }
 0x1e8   :  { %692 = vmatpush1.bf16.msra.mxu0 %v691_v0 }
 0x1e9   :  { %693 = vmatprep.subr.bf16.mxu0 %v786_v48 }
 0x1ec   :  { %695 = vmatpush1.bf16.msra.mxu0 %v694_v3 }
 0x1ed   :  { %696 = vmatprep.subr.bf16.mxu0 %v786_v48 }
 0x1f0   :  { %698 = vmatpush1.bf16.msra.mxu0 %v697_v6 }
 0x1f1   :  { %699 = vmatprep.subr.bf16.mxu0 %v786_v48 }
 0x1f4   :  { %701 = vmatpush1.bf16.msra.mxu0 %v700_v9 }
 0x2a2   :  { %v641_v28 = vpop.f32.mrb[0].mxu1  ;;  %v648_v29 = vpop.f32.mrb[2].mxu0 }
 0x2a3   :  { %v223_v30 = vmul.f32 2.0, %v641_v28  ;;  %v729_v31 = vpack.i.bf16 %v648_v29, %v863_v20  ;;  %v213_v32 = vpop.f32.mrb[1].mxu1  ;;  %v301_v33 = vpop.f32.mrb[3].mxu0 }
 0x2a4   :  { %v222_v34 = vmul.f32 2.0, %v213_v32  ;;  %v668_v35 = vpack.c.bf16 %v648_v29, %v301_v33  ;;  %v734_v39 = vpack.i.bf16 %v301_v33, %v860_v19 }
 0x2a5   :  { %v225_v36 = vsub.f32 %v223_v30, %v863_v20  ;;  %730 = vrot.lane.b32.xlu1 %v729_v31, %s785_s17 }
 0x2a6   :  { %v224_v37 = vsub.f32 %v222_v34, %v860_v19  ;;  %669 = vmatprep.subr.bf16.mxu1 %v668_v35 }
 0x2a7   :  { %v754_v38 = vpack.i.bf16 %v648_v29, %v225_v36  ;;  %671 = vmatpush3.bf16.msra.mxu1 %v668_v35  ;;  %v739_v40 = vpack.i.bf16 %v225_v36, %v875_v24 }
 0x2a8   :  { %v749_v41 = vpack.i.bf16 %v301_v33, %v224_v37  ;;  %v744_v42 = vpack.i.bf16 %v224_v37, %v877_v25  ;;  %702 = vmatprep.subr.bf16.mxu1 %v786_v48 }
 0x2a9   :  { %735 = vrot.lane.b32.xlu1 %v734_v39, %s785_s17  ;;  %740 = vrot.lane.b32.xlu0 %v739_v40, %s784_s1 }
 0x2aa   :  { %654 = vmatmul.mubr.msk.f32.vlgmr.msra.gmra.mrb[2].mxu1 %vm65_vm0, %v602_v27 }
 0x2ab   :  { %712 = vmatpush1.bf16.msra.mxu1 %v673_v46 }
 0x2ac   :  { %703 = vmatprep.subr.bf16.mxu1 %v786_v48 }
 0x2ad   :  { %745 = vrot.lane.b32.xlu0 %v744_v42, %s784_s1 }
 0x2af   :  { %713 = vmatpush1.bf16.msra.mxu1 %v676_v49 }
 0x2b0   :  { %704 = vmatprep.subr.bf16.mxu1 %v786_v48 }
 0x2b1   :  { %750 = vrot.lane.b32.xlu0 %v749_v41, %s787_s9 }
 0x2b3   :  { %714 = vmatpush1.bf16.msra.mxu1 %v679_v52 }
 0x2b4   :  { %705 = vmatprep.subr.bf16.mxu1 %v786_v48 }
 0x2b5   :  { %755 = vrot.lane.b32.xlu0 %v754_v38, %s787_s9 }
 0x2b7   :  { %715 = vmatpush1.bf16.msra.mxu1 %v682_v55 }
 0x2b8   :  { %706 = vmatprep.subr.bf16.mxu1 %v786_v48 }
 0x2bb   :  { %716 = vmatpush1.bf16.msra.mxu1 %v685_v58 }
 0x2bc   :  { %707 = vmatprep.subr.bf16.mxu1 %v786_v48 }
 0x2bf   :  { %717 = vmatpush1.bf16.msra.mxu1 %v688_v61 }
 0x2c0   :  { %708 = vmatprep.subr.bf16.mxu1 %v786_v48 }
 0x2c3   :  { %718 = vmatpush1.bf16.msra.mxu1 %v691_v0 }
 0x2c4   :  { %709 = vmatprep.subr.bf16.mxu1 %v786_v48 }
 0x2c7   :  { %719 = vmatpush1.bf16.msra.mxu1 %v694_v3 }
 0x2c8   :  { %710 = vmatprep.subr.bf16.mxu1 %v786_v48 }
 0x2cb   :  { %720 = vmatpush1.bf16.msra.mxu1 %v697_v6 }
 0x2cc   :  { %711 = vmatprep.subr.bf16.mxu1 %v786_v48 }
 0x2cf   :  { %721 = vmatpush1.bf16.msra.mxu1 %v700_v9 }
 0x317   :  { %v731_v10 = vpop.permute.xlu1 %730 }
 0x318   :  { %v732_v11 = vunpack.i.l.bf16 %v731_v10  ;;  %v733_v47 = vunpack.i.h.bf16 %v731_v10 }
 0x31a   :  { %v448_v12 = vsel %vm60_vm2, %v732_v11, %v875_v24 }
 0x31b   :  { %v736_v13 = vpop.permute.xlu1 %735  ;;  %v741_v14 = vpop.permute.xlu0 %740 }
 0x31c   :  { %v743_v15 = vunpack.i.h.bf16 %v741_v14  ;;  %v737_v16 = vunpack.i.l.bf16 %v736_v13  ;;  %v742_v37 = vunpack.i.l.bf16 %v741_v14  ;;  %v738_v43 = vunpack.i.h.bf16 %v736_v13 }
 0x31e   :  { %v450_v17 = vsel %vm415_vm3, %v448_v12, %v743_v15  ;;  %v447_v22 = vsel %vm60_vm2, %v737_v16, %v877_v25  ;;  %v414_v46 = vsel %vm60_vm2, %v863_v20, %v742_v37  ;;  %v607_v20 = vld [vmem:[%s1026_s4] ss:$0 sm:$0xff] }
 0x31f   :  { %v746_v18 = vpop.permute.xlu0 %745 }
 0x320   :  { %v748_v21 = vunpack.i.h.bf16 %v746_v18  ;;  %v747_v32 = vunpack.i.l.bf16 %v746_v18 }
 0x322   :  { %v449_v23 = vsel %vm415_vm3, %v447_v22, %v748_v21  ;;  %v413_v38 = vsel %vm60_vm2, %v860_v19, %v747_v32 }
 0x323   :  { %v751_v26 = vpop.permute.xlu0 %750 }
 0x324   :  { %v753_v27 = vunpack.i.h.bf16 %v751_v26  ;;  %v752_v33 = vunpack.i.l.bf16 %v751_v26 }
 0x326   :  { %v451_v28 = vsel %vm418_vm4, %v449_v23, %v753_v27  ;;  %v416_v42 = vsel %vm415_vm3, %v413_v38, %v752_v33 }
 0x327   :  { %v756_v29 = vpop.permute.xlu0 %755  ;;  %v419_v45 = vsel %vm418_vm4, %v416_v42, %v738_v43 }
 0x328   :  { %v758_v30 = vunpack.i.h.bf16 %v756_v29  ;;  %v757_v40 = vunpack.i.l.bf16 %v756_v29 }
 0x32a   :  { %v452_v31 = vsel %vm418_vm4, %v450_v17, %v758_v30  ;;  %v417_v19 = vsel %vm415_vm3, %v414_v46, %v757_v40 }
 0x37d   :  { %v655_v34 = vpop.f32.mrb[2].mxu1 }
 0x37e   :  { %v386_v35 = vmul.f32 2.0, %v655_v34  ;;  %v376_v36 = vpop.f32.mrb[3].mxu1 }
 0x37f   :  { %v385_v39 = vmul.f32 2.0, %v376_v36 }
 0x380   :  { %v388_v41 = vsub.f32 %v386_v35, %v875_v24  ;;  %v420_v24 = vsel %vm418_vm4, %v417_v19, %v733_v47 }
 0x381   :  { %v387_v44 = vsub.f32 %v385_v39, %v877_v25 }
 0x383   :  { %443 = vrot.lane.b32.xlu1 %v387_v44, %s785_s17  ;;  %608 = vmatprep.mubr.msk.f32.mxu0 %vm60_vm2, %v387_v44 }
 0x384   :  { %553 = vmatmul.mubr.f32.vlgmr.msra.gmra.mrb[4].mxu0 %v419_v45 }
 0x385   :  { %609 = vmatprep.mubr.msk.f32.mxu0 %vm60_vm2, %v388_v41 }
 0x387   :  { %445 = vrot.lane.b32.xlu1 %v388_v41, %s785_s17  ;;  %s788_s17 = smov [#allocation2]  }
 0x388   :  { %558 = vmatmul.mubr.f32.gmra.mrb[6].mxu0 %v420_v24  ;;  %s582_s9 = sshll.u32 %s788_s17, 4  ;;  %s583_s9 = int_to_ptr.vmem [resolvable:$true] %s582_s9 }
 0x389   :  { %s759_s4 = scalar_lea.vmem %s583_s9, 512  ;;  %p764_p1 = scmp.lt.s32.totalorder %s583_s9, %s583_s9 }
 0x38a   :  { %p760_p0 = scmp.ne.s32.totalorder %s583_s9, %s759_s4  ;;  %p765_p2 = scmp.lt.s32.totalorder %s759_s4, %s759_s4 }
 0x38c   :  { %p766_p3 = por %p765_p2, %p764_p1 }
 0x38e   :  { %p767_p4 = pnand %p766_p3, %p760_p0 }
 0x3f5   :  { %v444_v25 = vpop.permute.xlu1 %443 }
 0x3f6   :  { %610 = vmatprep.mubr.msk.f32.mxu1 %vm60_vm2, %v444_v25 }
 0x3f7   :  { %563 = vmatmul.mubr.f32.vlgmr.msra.gmra.mrb[4].mxu1 %v451_v28 }
 0x3f9   :  { %v446_v48 = vpop.permute.xlu1 %445 }
 0x3fa   :  { %611 = vmatprep.mubr.msk.f32.mxu1 %vm60_vm2, %v446_v48 }
 0x3fb   :  { %568 = vmatmul.mubr.f32.gmra.mrb[6].mxu1 %v452_v31 }
 0x457   :  { %v554_v49 = vpop.f32.mrb[4].mxu0 }
 0x458   :  { %v555_v50 = vadd.f32 %v607_v20, %v554_v49  ;;  %v556_v51 = vpop.f32.mrb[5].mxu0 }
 0x45a   :  { %573 = vst.msk [vmem:[#allocation2] sm:$0xff] %vm60_vm2, %v555_v50 }
 0x45b   :  { %v559_v52 = vpop.f32.mrb[6].mxu0 }
 0x45c   :  { %v560_v53 = vadd.f32 %v607_v20, %v559_v52  ;;  %v561_v54 = vpop.f32.mrb[7].mxu0 }
 0x45e   :  { %574 = vst.msk [vmem:[#allocation2 + $0x8] sm:$0xff] %vm60_vm2, %v560_v53 }
 0x4ca   :  { %v564_v55 = vpop.f32.mrb[4].mxu1 }
 0x4cb   :  { %v565_v56 = vadd.f32 %v607_v20, %v564_v55  ;;  %v566_v57 = vpop.f32.mrb[5].mxu1 }
 0x4cd   :  { %575 = vst.msk [vmem:[#allocation2 + $0x10] sm:$0xff] %vm60_vm2, %v565_v56 }
 0x4ce   :  { %v569_v58 = vpop.f32.mrb[6].mxu1 }
 0x4cf   :  { %v570_v59 = vadd.f32 %v607_v20, %v569_v58  ;;  %v571_v60 = vpop.f32.mrb[7].mxu1 }
 0x4d1   :  { %576 = vst.msk [vmem:[#allocation2 + $0x18] sm:$0xff] %vm60_vm2, %v570_v59 }
 0x4d2   :  { %770 = shalt.err (!%p767_p4)
}
 0x4d3   :  { %s771_s11 = scalar_lea.hbm %s1027_s5, 512 }
 0x4d4   :  { %p772_p5 = scmp.ne.s32.totalorder %s1027_s5, %s771_s11  ;;  %p775_p6 = scmp.lt.u32.totalorder %s771_s11, %s1027_s5 }
 0x4d6   :  { %p777_p7 = pnand %p775_p6, %p772_p5 }
 0x4d8   :  { %780 = shalt.err (!%p777_p7)
}
 0x4d9   :  { %s789_s15 = smov 128  }
 0x4da   :  { %588 = dma.vmem_to_hbm [thread:$0]  %s583_s9, 512, %s1027_s5, [#allocation3], %s789_s15, %s789_s15, %s783_s22  }
 0x4db   :  { %781 = dma.done.wait [#allocation3], 512  }
 0x4dc   :  { %782 = vsyncadd [#allocation3], 4294966784 }
 0x4dd   :  { %592 = vsyncpa [#allocation3], 1 }

</bundles_post_ra>
